<compile_context>
chip_gen: v7x
topology: tpu7x:2x2x1
jax: 0.10.0
libtpu: 0.0.40
codegen_flags: <defaults>
</compile_context>

<pallas_src>
import math
import functools

import jax
import jax.numpy as jnp
from jax import lax
from jax.experimental import pallas as pl
from jax.experimental.pallas import tpu as pltpu


def _attention_super_kernel(x_ref, wqkv_ref, wpt_ref, bp_ref, o_ref,
                            qkv_scr, ctx_scr, *, num_heads, head_dim, bblk, seq_len):
    """One batch block (bblk elements, bblk*N tokens) per grid step.

    x_ref    : (bblk*N, C)   bf16  input tokens (token-major, NO host transpose)
    wqkv_ref : (3C, C)       bf16  fused sampled qkv weight, rows [Q|K|V], Q pre-scaled
    wpt_ref  : (C, Cp)       bf16  output projection weight, pre-transposed + padded
    bp_ref   : (1, Cp)       f32   output projection bias (zero-padded)
    o_ref    : (bblk*N, Cp)  f32   output (padded feature dim, lane-dense store)
    qkv_scr  : (3C, bblk*N)        VMEM scratch: fused qkv projection (feature-major)
    ctx_scr  : (C, bblk*N)         VMEM scratch: concatenated per-head context
    """
    C = num_heads * head_dim
    d = head_dim
    N = seq_len

    # Fused QKV projection for the whole batch block. Contract both last dims
    # (A @ B^T orientation) -> (3C, bblk*N), feature-major for the head loop.
    qkv = lax.dot_general(wqkv_ref[...], x_ref[...],
                          (((1,), (1,)), ((), ())),
                          preferred_element_type=jnp.float32)
    qkv_scr[...] = qkv.astype(qkv_scr.dtype)

    # Per-(batch, head) attention. Static Python loop => fully unrolled with
    # static slice offsets; the LLO scheduler overlaps the next head's MXU
    # pushes with the current head's softmax.
    for b in range(bblk):
        col = b * N
        for h in range(num_heads):
            off = h * d
            qT = qkv_scr[pl.ds(off, d), pl.ds(col, N)].astype(jnp.bfloat16)           # (d, N)
            kT = qkv_scr[pl.ds(C + off, d), pl.ds(col, N)].astype(jnp.bfloat16)       # (d, N)
            vT = qkv_scr[pl.ds(2 * C + off, d), pl.ds(col, N)].astype(jnp.bfloat16)   # (d, N)

            # s[n, m] = sum_d q[n, d] * k[m, d]   (attention scale folded into Wq)
            s = lax.dot_general(qT, kT, (((0,), (0,)), ((), ())),
                                preferred_element_type=jnp.float32)                   # (N, N)
            s = s - jnp.max(s, axis=-1, keepdims=True)
            p = jnp.exp(s)
            p = p * pl.reciprocal(jnp.sum(p, axis=-1, keepdims=True), approx=True)

            # ctx_t[d, n] = sum_m v[m, d] * p[n, m]
            ctx_t = lax.dot_general(vT, p.astype(jnp.bfloat16),
                                    (((1,), (1,)), ((), ())),
                                    preferred_element_type=jnp.float32)               # (d, N)
            ctx_scr[pl.ds(off, d), pl.ds(col, N)] = ctx_t.astype(ctx_scr.dtype)

    # Output projection: y[t, j] = sum_c ctx[c, t] * WpT[c, j] + bias[j]
    y = lax.dot_general(ctx_scr[...].astype(jnp.bfloat16), wpt_ref[...],
                        (((0,), (0,)), ((), ())),
                        preferred_element_type=jnp.float32)                            # (bblk*N, Cp)
    o_ref[...] = (y + bp_ref[...]).astype(o_ref.dtype)


def _pick_batch_block(B, N, num_heads):
    """Largest divisor of B that keeps lanes/unroll/scratch bounded while
    respecting the (8,128) sublane constraint on the token-block axis."""
    best = 1
    for cand in range(1, B + 1):
        if B % cand != 0:
            continue
        if cand * N > 1024:                       # lane-axis / scratch cap
            continue
        if cand * num_heads > 64:                 # unrolled-loop cap
            continue
        if cand != B and (cand * N) % 8 != 0:     # sublane-aligned block rows
            continue
        best = cand
    return best


def attention_super_forward(x, w_qkv_s, w_proj_s, b_proj, *, num_heads, scale):
    """x: (B, N, C) f32.  Weights in the torch 'sampled' layout:
       w_qkv_s: (3C, C) rows [Q|K|V] (heads contiguous), w_proj_s: (C, C), b_proj: (C,)."""
    B, N, C = x.shape
    H = num_heads
    d = C // H
    assert C == H * d
    # f32 head slices must stay sublane-aligned (bf16 scratch additionally needs %16).
    assert d % 8 == 0, "head_dim must be a multiple of 8 for aligned head slices"

    scr_dtype = jnp.bfloat16 if (d % 16 == 0) else jnp.float32

    # Lane-dense output: pad projection out-dim to a multiple of 128.
    Cp = ((C + 127) // 128) * 128

    bblk = _pick_batch_block(B, N, H)
    ntok_blk = bblk * N
    grid = (B // bblk,)

    # Host-side (O(C^2), cheap) prep: fold attention scale into the Q rows of the
    # fused weight, pre-transpose + zero-pad the projection, bf16 matmul operands.
    # NOTE: assumes Q occupies rows [0:C] of the sampled qkv weight (true for the
    # default change_qkv=False sampling + reshape(B,N,3,H,d) ordering).
    wqkv = w_qkv_s.at[:C].multiply(scale).astype(jnp.bfloat16)                     # (3C, C)
    wpt = jnp.zeros((C, Cp), jnp.float32).at[:, :C].set(w_proj_s.T).astype(jnp.bfloat16)
    bp = jnp.zeros((1, Cp), jnp.float32).at[0, :C].set(b_proj)
    x2 = x.reshape(B * N, C).astype(jnp.bfloat16)                                  # no transpose

    # Footprint-derived VMEM limit, capped at 32 MiB (v7x physical is 64 MiB/TC).
    scr_item = 2 if scr_dtype == jnp.bfloat16 else 4
    block_bytes = (ntok_blk * C * 2 + 3 * C * C * 2 + C * Cp * 2 + Cp * 4
                   + ntok_blk * Cp * 4) * 2                    # double-buffered I/O
    scratch_bytes = 4 * C * ntok_blk * scr_item
    temp_bytes = 4 * (3 * C * ntok_blk + ntok_blk * Cp + bblk * H * N * N)
    vmem_limit = int(min(32 * 1024 * 1024,
                         max(16 * 1024 * 1024, 2 * (block_bytes + scratch_bytes + temp_bytes))))

    kernel = functools.partial(_attention_super_kernel,
                               num_heads=H, head_dim=d, bblk=bblk, seq_len=N)

    out = pl.pallas_call(
        kernel,
        out_shape=jax.ShapeDtypeStruct((B * N, Cp), jnp.float32),
        grid=grid,
        in_specs=[
            pl.BlockSpec((ntok_blk, C), lambda i: (i, 0)),
            pl.BlockSpec((3 * C, C), lambda i: (0, 0)),   # constant index -> fetched once
            pl.BlockSpec((C, Cp), lambda i: (0, 0)),
            pl.BlockSpec((1, Cp), lambda i: (0, 0)),
        ],
        out_specs=pl.BlockSpec((ntok_blk, Cp), lambda i: (i, 0)),
        scratch_shapes=[
            pltpu.VMEM((3 * C, ntok_blk), scr_dtype),   # fused qkv projection
            pltpu.VMEM((C, ntok_blk), scr_dtype),       # concatenated head context
        ],
        compiler_params=pltpu.CompilerParams(
            # TODO(synk): pltpu.CORE_PARALLEL on the batch axis for v7x (2 TCs/chip).
            dimension_semantics=("parallel",),
            vmem_limit_bytes=vmem_limit,
        ),
    )(x2, wqkv, wpt, bp)
    # TODO(synk): flash-style q/kv tiling (online softmax) once the per-step live
    # set (qkv/ctx scratch + (N,N) scores + double-buffered I/O) approaches the
    # VMEM cap — threshold is ~2x lower on v7x (64 MiB) than v5e/v6e (128 MiB).

    if Cp != C:
        out = out[:, :C]
    return out.reshape(B, N, C)


# ---------------- parameter construction (plain-JAX glue) ----------------

def xavier_uniform(key, shape):
    fan_out, fan_in = shape
    bound = math.sqrt(6.0 / (fan_in + fan_out))
    return jax.random.uniform(key, shape, jnp.float32, -bound, bound)


def sample_weight_rows(w, sample_out_dim):
    # torch sample_weight(): cat([w[i:sample_out_dim:3] for i in range(3)], dim=0)
    perm = jnp.concatenate([jnp.arange(i, sample_out_dim, 3) for i in range(3)])
    return w[perm]


if __name__ == "__main__":
    # small shapes consistent with the module's forward: B, N (tokens), C (embed)
    B, N, C, H = 2, 8, 32, 4
    d = C // H

    key = jax.random.PRNGKey(0)
    kx, kqkv, kp = jax.random.split(key, 3)
    x = jax.random.normal(kx, (B, N, C), jnp.float32)

    # qkv = LinearSuper(C, 3C, bias=False): xavier weight + row-interleave sampling.
    w_qkv = xavier_uniform(kqkv, (3 * C, C))
    w_qkv_s = sample_weight_rows(w_qkv, 3 * C)                     # (3C, C)

    # proj = LinearSuper(C, C): xavier weight, zero bias, sampled at (C, C).
    w_proj = xavier_uniform(kp, (C, C))
    w_proj_s = sample_weight_rows(w_proj, C)                       # (C, C)
    b_proj = jnp.zeros((C,), jnp.float32)

    # change_qkv=False -> sample_scale = (sample_in_embed_dim // num_heads) ** -0.5
    sample_scale = float(d) ** -0.5

    # TODO(synk): relative_position=True (RelativePosition2D_super bias) and the
    # change_qkv=True LoRA path are inactive under the default config; not lowered.

    out = attention_super_forward(x, w_qkv_s, w_proj_s, b_proj,
                                  num_heads=H, scale=sample_scale)
    out = jax.block_until_ready(out)

    # pure-JAX f32 reference of the torch forward (eval mode, dropout p=0)
    qkv = jnp.einsum("bnc,oc->bno", x, w_qkv_s).reshape(B, N, 3, H, d)
    qkv = qkv.transpose(2, 0, 3, 1, 4)
    q, k, v = qkv[0], qkv[1], qkv[2]
    attn = jnp.einsum("bhnd,bhmd->bhnm", q, k) * sample_scale
    attn = jax.nn.softmax(attn, axis=-1)
    ref = jnp.einsum("bhnm,bhmd->bhnd", attn, v).transpose(0, 2, 1, 3).reshape(B, N, C)
    ref = jnp.einsum("bnc,oc->bno", ref, w_proj_s) + b_proj

    err = float(jnp.max(jnp.abs(out - ref)))
    # bf16 matmul operands + approx reciprocal -> relaxed tolerance vs f32 reference
    assert jnp.allclose(out, ref, atol=5e-2, rtol=5e-2), err
    print("KERNEL_OK")
</pallas_src>

<mosaic_0001>
module attributes {stable_mosaic.version = 11 : i64} {
  func.func @_attention_super_kernel(%arg0: i32, %arg1: memref<16x32xbf16, #tpu.memory_space<vmem>>, %arg2: memref<96x32xbf16, #tpu.memory_space<vmem>>, %arg3: memref<32x128xbf16, #tpu.memory_space<vmem>>, %arg4: memref<1x128xf32, #tpu.memory_space<vmem>>, %arg5: memref<16x128xf32, #tpu.memory_space<vmem>>, %arg6: memref<96x16xf32, #tpu.memory_space<vmem>>, %arg7: memref<32x16xf32, #tpu.memory_space<vmem>>) attributes {dimension_semantics = [#tpu.dimension_semantics<parallel>], iteration_bounds = array<i64: 1>, scalar_prefetch = 0 : i64, scratch_operands = 2 : i64, tpu.core_type = #tpu.core_type<tc>, window_params = [{transform_indices = @transform_0, window_bounds = array<i64: 16, 32>}, {pipeline_mode = #tpu.pipeline_mode<synchronous>, transform_indices = @transform_1, window_bounds = array<i64: 96, 32>}, {pipeline_mode = #tpu.pipeline_mode<synchronous>, transform_indices = @transform_2, window_bounds = array<i64: 32, 128>}, {pipeline_mode = #tpu.pipeline_mode<synchronous>, transform_indices = @transform_3, window_bounds = array<i64: 1, 128>}, {transform_indices = @transform_4, window_bounds = array<i64: 16, 128>}]} {
    %c0 = arith.constant 0 : index
    %c0_0 = arith.constant 0 : index
    %0 = vector.load %arg2[%c0, %c0_0] : memref<96x32xbf16, #tpu.memory_space<vmem>>, vector<96x32xbf16>
    %c0_1 = arith.constant 0 : index
    %c0_2 = arith.constant 0 : index
    %1 = vector.load %arg1[%c0_1, %c0_2] : memref<16x32xbf16, #tpu.memory_space<vmem>>, vector<16x32xbf16>
    %cst = arith.constant dense<0.000000e+00> : vector<96x16xf32>
    %2 = tpu.matmul %0, %1, %cst {dimension_numbers = #tpu.dot_dimension_numbers<[1], [1], [0], [0], [0, 0, 1, 0], [], []>} : vector<96x32xbf16>, vector<16x32xbf16>, vector<96x16xf32> -> vector<96x16xf32>
    %c0_3 = arith.constant 0 : index
    %c0_4 = arith.constant 0 : index
    %3 = vector.load %arg6[%c0_3, %c0_4] : memref<96x16xf32, #tpu.memory_space<vmem>>, vector<96x16xf32>
    tpu.vector_store %arg6[%c0_3, %c0_4], %2 {strides = array<i32>} : memref<96x16xf32, #tpu.memory_space<vmem>>, vector<96x16xf32>,
    %c0_5 = arith.constant 0 : index
    %c0_6 = arith.constant 0 : index
    %4 = vector.load %arg6[%c0_5, %c0_6] : memref<96x16xf32, #tpu.memory_space<vmem>>, vector<8x8xf32>
    %5 = arith.truncf %4 : vector<8x8xf32> to vector<8x8xbf16>
    %c32 = arith.constant 32 : index
    %c0_7 = arith.constant 0 : index
    %6 = vector.load %arg6[%c32, %c0_7] : memref<96x16xf32, #tpu.memory_space<vmem>>, vector<8x8xf32>
    %7 = arith.truncf %6 : vector<8x8xf32> to vector<8x8xbf16>
    %c64 = arith.constant 64 : index
    %c0_8 = arith.constant 0 : index
    %8 = vector.load %arg6[%c64, %c0_8] : memref<96x16xf32, #tpu.memory_space<vmem>>, vector<8x8xf32>
    %9 = arith.truncf %8 : vector<8x8xf32> to vector<8x8xbf16>
    %cst_9 = arith.constant dense<0.000000e+00> : vector<8x8xf32>
    %10 = tpu.matmul %5, %7, %cst_9 {dimension_numbers = #tpu.dot_dimension_numbers<[0], [0], [1], [1], [0, 1, 1, 1], [], []>} : vector<8x8xbf16>, vector<8x8xbf16>, vector<8x8xf32> -> vector<8x8xf32>
    %cst_10 = arith.constant dense<0xFF800000> : vector<8xf32>
    %11 = vector.multi_reduction <maximumf>, %10, %cst_10 [1] : vector<8x8xf32> to vector<8xf32>
    %12 = vector.shape_cast %11 : vector<8xf32> to vector<8x1xf32>
    %13 = vector.broadcast %12 : vector<8x1xf32> to vector<8x8xf32>
    %14 = arith.subf %10, %13 : vector<8x8xf32>
    %15 = math.exp %14 : vector<8x8xf32>
    %cst_11 = arith.constant dense<0.000000e+00> : vector<8xf32>
    %16 = vector.multi_reduction <add>, %15, %cst_11 [1] : vector<8x8xf32> to vector<8xf32>
    %17 = vector.shape_cast %16 : vector<8xf32> to vector<8x1xf32>
    %18 = tpu.reciprocal %17 {approx = true} : vector<8x1xf32> -> vector<8x1xf32>
    %19 = vector.broadcast %18 : vector<8x1xf32> to vector<8x8xf32>
    %20 = arith.mulf %15, %19 : vector<8x8xf32>
    %21 = arith.truncf %20 : vector<8x8xf32> to vector<8x8xbf16>
    %cst_12 = arith.constant dense<0.000000e+00> : vector<8x8xf32>
    %22 = tpu.matmul %9, %21, %cst_12 {dimension_numbers = #tpu.dot_dimension_numbers<[1], [1], [0], [0], [0, 0, 1, 0], [], []>} : vector<8x8xbf16>, vector<8x8xbf16>, vector<8x8xf32> -> vector<8x8xf32>
    %c0_13 = arith.constant 0 : index
    %c0_14 = arith.constant 0 : index
    %23 = vector.load %arg7[%c0_13, %c0_14] : memref<32x16xf32, #tpu.memory_space<vmem>>, vector<8x8xf32>
    tpu.vector_store %arg7[%c0_13, %c0_14], %22 {strides = array<i32>} : memref<32x16xf32, #tpu.memory_space<vmem>>, vector<8x8xf32>,
    %c8 = arith.constant 8 : index
    %c0_15 = arith.constant 0 : index
    %24 = vector.load %arg6[%c8, %c0_15] : memref<96x16xf32, #tpu.memory_space<vmem>>, vector<8x8xf32>
    %25 = arith.truncf %24 : vector<8x8xf32> to vector<8x8xbf16>
    %c40 = arith.constant 40 : index
    %c0_16 = arith.constant 0 : index
    %26 = vector.load %arg6[%c40, %c0_16] : memref<96x16xf32, #tpu.memory_space<vmem>>, vector<8x8xf32>
    %27 = arith.truncf %26 : vector<8x8xf32> to vector<8x8xbf16>
    %c72 = arith.constant 72 : index
    %c0_17 = arith.constant 0 : index
    %28 = vector.load %arg6[%c72, %c0_17] : memref<96x16xf32, #tpu.memory_space<vmem>>, vector<8x8xf32>
    %29 = arith.truncf %28 : vector<8x8xf32> to vector<8x8xbf16>
    %cst_18 = arith.constant dense<0.000000e+00> : vector<8x8xf32>
    %30 = tpu.matmul %25, %27, %cst_18 {dimension_numbers = #tpu.dot_dimension_numbers<[0], [0], [1], [1], [0, 1, 1, 1], [], []>} : vector<8x8xbf16>, vector<8x8xbf16>, vector<8x8xf32> -> vector<8x8xf32>
    %cst_19 = arith.constant dense<0xFF800000> : vector<8xf32>
    %31 = vector.multi_reduction <maximumf>, %30, %cst_19 [1] : vector<8x8xf32> to vector<8xf32>
    %32 = vector.shape_cast %31 : vector<8xf32> to vector<8x1xf32>
    %33 = vector.broadcast %32 : vector<8x1xf32> to vector<8x8xf32>
    %34 = arith.subf %30, %33 : vector<8x8xf32>
    %35 = math.exp %34 : vector<8x8xf32>
    %cst_20 = arith.constant dense<0.000000e+00> : vector<8xf32>
    %36 = vector.multi_reduction <add>, %35, %cst_20 [1] : vector<8x8xf32> to vector<8xf32>
    %37 = vector.shape_cast %36 : vector<8xf32> to vector<8x1xf32>
    %38 = tpu.reciprocal %37 {approx = true} : vector<8x1xf32> -> vector<8x1xf32>
    %39 = vector.broadcast %38 : vector<8x1xf32> to vector<8x8xf32>
    %40 = arith.mulf %35, %39 : vector<8x8xf32>
    %41 = arith.truncf %40 : vector<8x8xf32> to vector<8x8xbf16>
    %cst_21 = arith.constant dense<0.000000e+00> : vector<8x8xf32>
    %42 = tpu.matmul %29, %41, %cst_21 {dimension_numbers = #tpu.dot_dimension_numbers<[1], [1], [0], [0], [0, 0, 1, 0], [], []>} : vector<8x8xbf16>, vector<8x8xbf16>, vector<8x8xf32> -> vector<8x8xf32>
    %c8_22 = arith.constant 8 : index
    %c0_23 = arith.constant 0 : index
    %43 = vector.load %arg7[%c8_22, %c0_23] : memref<32x16xf32, #tpu.memory_space<vmem>>, vector<8x8xf32>
    tpu.vector_store %arg7[%c8_22, %c0_23], %42 {strides = array<i32>} : memref<32x16xf32, #tpu.memory_space<vmem>>, vector<8x8xf32>,
    %c16 = arith.constant 16 : index
    %c0_24 = arith.constant 0 : index
    %44 = vector.load %arg6[%c16, %c0_24] : memref<96x16xf32, #tpu.memory_space<vmem>>, vector<8x8xf32>
    %45 = arith.truncf %44 : vector<8x8xf32> to vector<8x8xbf16>
    %c48 = arith.constant 48 : index
    %c0_25 = arith.constant 0 : index
    %46 = vector.load %arg6[%c48, %c0_25] : memref<96x16xf32, #tpu.memory_space<vmem>>, vector<8x8xf32>
    %47 = arith.truncf %46 : vector<8x8xf32> to vector<8x8xbf16>
    %c80 = arith.constant 80 : index
    %c0_26 = arith.constant 0 : index
    %48 = vector.load %arg6[%c80, %c0_26] : memref<96x16xf32, #tpu.memory_space<vmem>>, vector<8x8xf32>
    %49 = arith.truncf %48 : vector<8x8xf32> to vector<8x8xbf16>
    %cst_27 = arith.constant dense<0.000000e+00> : vector<8x8xf32>
    %50 = tpu.matmul %45, %47, %cst_27 {dimension_numbers = #tpu.dot_dimension_numbers<[0], [0], [1], [1], [0, 1, 1, 1], [], []>} : vector<8x8xbf16>, vector<8x8xbf16>, vector<8x8xf32> -> vector<8x8xf32>
    %cst_28 = arith.constant dense<0xFF800000> : vector<8xf32>
    %51 = vector.multi_reduction <maximumf>, %50, %cst_28 [1] : vector<8x8xf32> to vector<8xf32>
    %52 = vector.shape_cast %51 : vector<8xf32> to vector<8x1xf32>
    %53 = vector.broadcast %52 : vector<8x1xf32> to vector<8x8xf32>
    %54 = arith.subf %50, %53 : vector<8x8xf32>
    %55 = math.exp %54 : vector<8x8xf32>
    %cst_29 = arith.constant dense<0.000000e+00> : vector<8xf32>
    %56 = vector.multi_reduction <add>, %55, %cst_29 [1] : vector<8x8xf32> to vector<8xf32>
    %57 = vector.shape_cast %56 : vector<8xf32> to vector<8x1xf32>
    %58 = tpu.reciprocal %57 {approx = true} : vector<8x1xf32> -> vector<8x1xf32>
    %59 = vector.broadcast %58 : vector<8x1xf32> to vector<8x8xf32>
    %60 = arith.mulf %55, %59 : vector<8x8xf32>
    %61 = arith.truncf %60 : vector<8x8xf32> to vector<8x8xbf16>
    %cst_30 = arith.constant dense<0.000000e+00> : vector<8x8xf32>
    %62 = tpu.matmul %49, %61, %cst_30 {dimension_numbers = #tpu.dot_dimension_numbers<[1], [1], [0], [0], [0, 0, 1, 0], [], []>} : vector<8x8xbf16>, vector<8x8xbf16>, vector<8x8xf32> -> vector<8x8xf32>
    %c16_31 = arith.constant 16 : index
    %c0_32 = arith.constant 0 : index
    %63 = vector.load %arg7[%c16_31, %c0_32] : memref<32x16xf32, #tpu.memory_space<vmem>>, vector<8x8xf32>
    tpu.vector_store %arg7[%c16_31, %c0_32], %62 {strides = array<i32>} : memref<32x16xf32, #tpu.memory_space<vmem>>, vector<8x8xf32>,
    %c24 = arith.constant 24 : index
    %c0_33 = arith.constant 0 : index
    %64 = vector.load %arg6[%c24, %c0_33] : memref<96x16xf32, #tpu.memory_space<vmem>>, vector<8x8xf32>
    %65 = arith.truncf %64 : vector<8x8xf32> to vector<8x8xbf16>
    %c56 = arith.constant 56 : index
    %c0_34 = arith.constant 0 : index
    %66 = vector.load %arg6[%c56, %c0_34] : memref<96x16xf32, #tpu.memory_space<vmem>>, vector<8x8xf32>
    %67 = arith.truncf %66 : vector<8x8xf32> to vector<8x8xbf16>
    %c88 = arith.constant 88 : index
    %c0_35 = arith.constant 0 : index
    %68 = vector.load %arg6[%c88, %c0_35] : memref<96x16xf32, #tpu.memory_space<vmem>>, vector<8x8xf32>
    %69 = arith.truncf %68 : vector<8x8xf32> to vector<8x8xbf16>
    %cst_36 = arith.constant dense<0.000000e+00> : vector<8x8xf32>
    %70 = tpu.matmul %65, %67, %cst_36 {dimension_numbers = #tpu.dot_dimension_numbers<[0], [0], [1], [1], [0, 1, 1, 1], [], []>} : vector<8x8xbf16>, vector<8x8xbf16>, vector<8x8xf32> -> vector<8x8xf32>
    %cst_37 = arith.constant dense<0xFF800000> : vector<8xf32>
    %71 = vector.multi_reduction <maximumf>, %70, %cst_37 [1] : vector<8x8xf32> to vector<8xf32>
    %72 = vector.shape_cast %71 : vector<8xf32> to vector<8x1xf32>
    %73 = vector.broadcast %72 : vector<8x1xf32> to vector<8x8xf32>
    %74 = arith.subf %70, %73 : vector<8x8xf32>
    %75 = math.exp %74 : vector<8x8xf32>
    %cst_38 = arith.constant dense<0.000000e+00> : vector<8xf32>
    %76 = vector.multi_reduction <add>, %75, %cst_38 [1] : vector<8x8xf32> to vector<8xf32>
    %77 = vector.shape_cast %76 : vector<8xf32> to vector<8x1xf32>
    %78 = tpu.reciprocal %77 {approx = true} : vector<8x1xf32> -> vector<8x1xf32>
    %79 = vector.broadcast %78 : vector<8x1xf32> to vector<8x8xf32>
    %80 = arith.mulf %75, %79 : vector<8x8xf32>
    %81 = arith.truncf %80 : vector<8x8xf32> to vector<8x8xbf16>
    %cst_39 = arith.constant dense<0.000000e+00> : vector<8x8xf32>
    %82 = tpu.matmul %69, %81, %cst_39 {dimension_numbers = #tpu.dot_dimension_numbers<[1], [1], [0], [0], [0, 0, 1, 0], [], []>} : vector<8x8xbf16>, vector<8x8xbf16>, vector<8x8xf32> -> vector<8x8xf32>
    %c24_40 = arith.constant 24 : index
    %c0_41 = arith.constant 0 : index
    %83 = vector.load %arg7[%c24_40, %c0_41] : memref<32x16xf32, #tpu.memory_space<vmem>>, vector<8x8xf32>
    tpu.vector_store %arg7[%c24_40, %c0_41], %82 {strides = array<i32>} : memref<32x16xf32, #tpu.memory_space<vmem>>, vector<8x8xf32>,
    %c0_42 = arith.constant 0 : index
    %c8_43 = arith.constant 8 : index
    %84 = vector.load %arg6[%c0_42, %c8_43] : memref<96x16xf32, #tpu.memory_space<vmem>>, vector<8x8xf32>
    %85 = arith.truncf %84 : vector<8x8xf32> to vector<8x8xbf16>
    %c32_44 = arith.constant 32 : index
    %c8_45 = arith.constant 8 : index
    %86 = vector.load %arg6[%c32_44, %c8_45] : memref<96x16xf32, #tpu.memory_space<vmem>>, vector<8x8xf32>
    %87 = arith.truncf %86 : vector<8x8xf32> to vector<8x8xbf16>
    %c64_46 = arith.constant 64 : index
    %c8_47 = arith.constant 8 : index
    %88 = vector.load %arg6[%c64_46, %c8_47] : memref<96x16xf32, #tpu.memory_space<vmem>>, vector<8x8xf32>
    %89 = arith.truncf %88 : vector<8x8xf32> to vector<8x8xbf16>
    %cst_48 = arith.constant dense<0.000000e+00> : vector<8x8xf32>
    %90 = tpu.matmul %85, %87, %cst_48 {dimension_numbers = #tpu.dot_dimension_numbers<[0], [0], [1], [1], [0, 1, 1, 1], [], []>} : vector<8x8xbf16>, vector<8x8xbf16>, vector<8x8xf32> -> vector<8x8xf32>
    %cst_49 = arith.constant dense<0xFF800000> : vector<8xf32>
    %91 = vector.multi_reduction <maximumf>, %90, %cst_49 [1] : vector<8x8xf32> to vector<8xf32>
    %92 = vector.shape_cast %91 : vector<8xf32> to vector<8x1xf32>
    %93 = vector.broadcast %92 : vector<8x1xf32> to vector<8x8xf32>
    %94 = arith.subf %90, %93 : vector<8x8xf32>
    %95 = math.exp %94 : vector<8x8xf32>
    %cst_50 = arith.constant dense<0.000000e+00> : vector<8xf32>
    %96 = vector.multi_reduction <add>, %95, %cst_50 [1] : vector<8x8xf32> to vector<8xf32>
    %97 = vector.shape_cast %96 : vector<8xf32> to vector<8x1xf32>
    %98 = tpu.reciprocal %97 {approx = true} : vector<8x1xf32> -> vector<8x1xf32>
    %99 = vector.broadcast %98 : vector<8x1xf32> to vector<8x8xf32>
    %100 = arith.mulf %95, %99 : vector<8x8xf32>
    %101 = arith.truncf %100 : vector<8x8xf32> to vector<8x8xbf16>
    %cst_51 = arith.constant dense<0.000000e+00> : vector<8x8xf32>
    %102 = tpu.matmul %89, %101, %cst_51 {dimension_numbers = #tpu.dot_dimension_numbers<[1], [1], [0], [0], [0, 0, 1, 0], [], []>} : vector<8x8xbf16>, vector<8x8xbf16>, vector<8x8xf32> -> vector<8x8xf32>
    %c0_52 = arith.constant 0 : index
    %c8_53 = arith.constant 8 : index
    %103 = vector.load %arg7[%c0_52, %c8_53] : memref<32x16xf32, #tpu.memory_space<vmem>>, vector<8x8xf32>
    tpu.vector_store %arg7[%c0_52, %c8_53], %102 {strides = array<i32>} : memref<32x16xf32, #tpu.memory_space<vmem>>, vector<8x8xf32>,
    %c8_54 = arith.constant 8 : index
    %c8_55 = arith.constant 8 : index
    %104 = vector.load %arg6[%c8_54, %c8_55] : memref<96x16xf32, #tpu.memory_space<vmem>>, vector<8x8xf32>
    %105 = arith.truncf %104 : vector<8x8xf32> to vector<8x8xbf16>
    %c40_56 = arith.constant 40 : index
    %c8_57 = arith.constant 8 : index
    %106 = vector.load %arg6[%c40_56, %c8_57] : memref<96x16xf32, #tpu.memory_space<vmem>>, vector<8x8xf32>
    %107 = arith.truncf %106 : vector<8x8xf32> to vector<8x8xbf16>
    %c72_58 = arith.constant 72 : index
    %c8_59 = arith.constant 8 : index
    %108 = vector.load %arg6[%c72_58, %c8_59] : memref<96x16xf32, #tpu.memory_space<vmem>>, vector<8x8xf32>
    %109 = arith.truncf %108 : vector<8x8xf32> to vector<8x8xbf16>
    %cst_60 = arith.constant dense<0.000000e+00> : vector<8x8xf32>
    %110 = tpu.matmul %105, %107, %cst_60 {dimension_numbers = #tpu.dot_dimension_numbers<[0], [0], [1], [1], [0, 1, 1, 1], [], []>} : vector<8x8xbf16>, vector<8x8xbf16>, vector<8x8xf32> -> vector<8x8xf32>
    %cst_61 = arith.constant dense<0xFF800000> : vector<8xf32>
    %111 = vector.multi_reduction <maximumf>, %110, %cst_61 [1] : vector<8x8xf32> to vector<8xf32>
    %112 = vector.shape_cast %111 : vector<8xf32> to vector<8x1xf32>
    %113 = vector.broadcast %112 : vector<8x1xf32> to vector<8x8xf32>
    %114 = arith.subf %110, %113 : vector<8x8xf32>
    %115 = math.exp %114 : vector<8x8xf32>
    %cst_62 = arith.constant dense<0.000000e+00> : vector<8xf32>
    %116 = vector.multi_reduction <add>, %115, %cst_62 [1] : vector<8x8xf32> to vector<8xf32>
    %117 = vector.shape_cast %116 : vector<8xf32> to vector<8x1xf32>
    %118 = tpu.reciprocal %117 {approx = true} : vector<8x1xf32> -> vector<8x1xf32>
    %119 = vector.broadcast %118 : vector<8x1xf32> to vector<8x8xf32>
    %120 = arith.mulf %115, %119 : vector<8x8xf32>
    %121 = arith.truncf %120 : vector<8x8xf32> to vector<8x8xbf16>
    %cst_63 = arith.constant dense<0.000000e+00> : vector<8x8xf32>
    %122 = tpu.matmul %109, %121, %cst_63 {dimension_numbers = #tpu.dot_dimension_numbers<[1], [1], [0], [0], [0, 0, 1, 0], [], []>} : vector<8x8xbf16>, vector<8x8xbf16>, vector<8x8xf32> -> vector<8x8xf32>
    %c8_64 = arith.constant 8 : index
    %c8_65 = arith.constant 8 : index
    %123 = vector.load %arg7[%c8_64, %c8_65] : memref<32x16xf32, #tpu.memory_space<vmem>>, vector<8x8xf32>
    tpu.vector_store %arg7[%c8_64, %c8_65], %122 {strides = array<i32>} : memref<32x16xf32, #tpu.memory_space<vmem>>, vector<8x8xf32>,
    %c16_66 = arith.constant 16 : index
    %c8_67 = arith.constant 8 : index
    %124 = vector.load %arg6[%c16_66, %c8_67] : memref<96x16xf32, #tpu.memory_space<vmem>>, vector<8x8xf32>
    %125 = arith.truncf %124 : vector<8x8xf32> to vector<8x8xbf16>
    %c48_68 = arith.constant 48 : index
    %c8_69 = arith.constant 8 : index
    %126 = vector.load %arg6[%c48_68, %c8_69] : memref<96x16xf32, #tpu.memory_space<vmem>>, vector<8x8xf32>
    %127 = arith.truncf %126 : vector<8x8xf32> to vector<8x8xbf16>
    %c80_70 = arith.constant 80 : index
    %c8_71 = arith.constant 8 : index
    %128 = vector.load %arg6[%c80_70, %c8_71] : memref<96x16xf32, #tpu.memory_space<vmem>>, vector<8x8xf32>
    %129 = arith.truncf %128 : vector<8x8xf32> to vector<8x8xbf16>
    %cst_72 = arith.constant dense<0.000000e+00> : vector<8x8xf32>
    %130 = tpu.matmul %125, %127, %cst_72 {dimension_numbers = #tpu.dot_dimension_numbers<[0], [0], [1], [1], [0, 1, 1, 1], [], []>} : vector<8x8xbf16>, vector<8x8xbf16>, vector<8x8xf32> -> vector<8x8xf32>
    %cst_73 = arith.constant dense<0xFF800000> : vector<8xf32>
    %131 = vector.multi_reduction <maximumf>, %130, %cst_73 [1] : vector<8x8xf32> to vector<8xf32>
    %132 = vector.shape_cast %131 : vector<8xf32> to vector<8x1xf32>
    %133 = vector.broadcast %132 : vector<8x1xf32> to vector<8x8xf32>
    %134 = arith.subf %130, %133 : vector<8x8xf32>
    %135 = math.exp %134 : vector<8x8xf32>
    %cst_74 = arith.constant dense<0.000000e+00> : vector<8xf32>
    %136 = vector.multi_reduction <add>, %135, %cst_74 [1] : vector<8x8xf32> to vector<8xf32>
    %137 = vector.shape_cast %136 : vector<8xf32> to vector<8x1xf32>
    %138 = tpu.reciprocal %137 {approx = true} : vector<8x1xf32> -> vector<8x1xf32>
    %139 = vector.broadcast %138 : vector<8x1xf32> to vector<8x8xf32>
    %140 = arith.mulf %135, %139 : vector<8x8xf32>
    %141 = arith.truncf %140 : vector<8x8xf32> to vector<8x8xbf16>
    %cst_75 = arith.constant dense<0.000000e+00> : vector<8x8xf32>
    %142 = tpu.matmul %129, %141, %cst_75 {dimension_numbers = #tpu.dot_dimension_numbers<[1], [1], [0], [0], [0, 0, 1, 0], [], []>} : vector<8x8xbf16>, vector<8x8xbf16>, vector<8x8xf32> -> vector<8x8xf32>
    %c16_76 = arith.constant 16 : index
    %c8_77 = arith.constant 8 : index
    %143 = vector.load %arg7[%c16_76, %c8_77] : memref<32x16xf32, #tpu.memory_space<vmem>>, vector<8x8xf32>
    tpu.vector_store %arg7[%c16_76, %c8_77], %142 {strides = array<i32>} : memref<32x16xf32, #tpu.memory_space<vmem>>, vector<8x8xf32>,
    %c24_78 = arith.constant 24 : index
    %c8_79 = arith.constant 8 : index
    %144 = vector.load %arg6[%c24_78, %c8_79] : memref<96x16xf32, #tpu.memory_space<vmem>>, vector<8x8xf32>
    %145 = arith.truncf %144 : vector<8x8xf32> to vector<8x8xbf16>
    %c56_80 = arith.constant 56 : index
    %c8_81 = arith.constant 8 : index
    %146 = vector.load %arg6[%c56_80, %c8_81] : memref<96x16xf32, #tpu.memory_space<vmem>>, vector<8x8xf32>
    %147 = arith.truncf %146 : vector<8x8xf32> to vector<8x8xbf16>
    %c88_82 = arith.constant 88 : index
    %c8_83 = arith.constant 8 : index
    %148 = vector.load %arg6[%c88_82, %c8_83] : memref<96x16xf32, #tpu.memory_space<vmem>>, vector<8x8xf32>
    %149 = arith.truncf %148 : vector<8x8xf32> to vector<8x8xbf16>
    %cst_84 = arith.constant dense<0.000000e+00> : vector<8x8xf32>
    %150 = tpu.matmul %145, %147, %cst_84 {dimension_numbers = #tpu.dot_dimension_numbers<[0], [0], [1], [1], [0, 1, 1, 1], [], []>} : vector<8x8xbf16>, vector<8x8xbf16>, vector<8x8xf32> -> vector<8x8xf32>
    %cst_85 = arith.constant dense<0xFF800000> : vector<8xf32>
    %151 = vector.multi_reduction <maximumf>, %150, %cst_85 [1] : vector<8x8xf32> to vector<8xf32>
    %152 = vector.shape_cast %151 : vector<8xf32> to vector<8x1xf32>
    %153 = vector.broadcast %152 : vector<8x1xf32> to vector<8x8xf32>
    %154 = arith.subf %150, %153 : vector<8x8xf32>
    %155 = math.exp %154 : vector<8x8xf32>
    %cst_86 = arith.constant dense<0.000000e+00> : vector<8xf32>
    %156 = vector.multi_reduction <add>, %155, %cst_86 [1] : vector<8x8xf32> to vector<8xf32>
    %157 = vector.shape_cast %156 : vector<8xf32> to vector<8x1xf32>
    %158 = tpu.reciprocal %157 {approx = true} : vector<8x1xf32> -> vector<8x1xf32>
    %159 = vector.broadcast %158 : vector<8x1xf32> to vector<8x8xf32>
    %160 = arith.mulf %155, %159 : vector<8x8xf32>
    %161 = arith.truncf %160 : vector<8x8xf32> to vector<8x8xbf16>
    %cst_87 = arith.constant dense<0.000000e+00> : vector<8x8xf32>
    %162 = tpu.matmul %149, %161, %cst_87 {dimension_numbers = #tpu.dot_dimension_numbers<[1], [1], [0], [0], [0, 0, 1, 0], [], []>} : vector<8x8xbf16>, vector<8x8xbf16>, vector<8x8xf32> -> vector<8x8xf32>
    %c24_88 = arith.constant 24 : index
    %c8_89 = arith.constant 8 : index
    %163 = vector.load %arg7[%c24_88, %c8_89] : memref<32x16xf32, #tpu.memory_space<vmem>>, vector<8x8xf32>
    tpu.vector_store %arg7[%c24_88, %c8_89], %162 {strides = array<i32>} : memref<32x16xf32, #tpu.memory_space<vmem>>, vector<8x8xf32>,
    %c0_90 = arith.constant 0 : index
    %c0_91 = arith.constant 0 : index
    %164 = vector.load %arg7[%c0_90, %c0_91] : memref<32x16xf32, #tpu.memory_space<vmem>>, vector<32x16xf32>
    %165 = arith.truncf %164 : vector<32x16xf32> to vector<32x16xbf16>
    %c0_92 = arith.constant 0 : index
    %c0_93 = arith.constant 0 : index
    %166 = vector.load %arg3[%c0_92, %c0_93] : memref<32x128xbf16, #tpu.memory_space<vmem>>, vector<32x128xbf16>
    %cst_94 = arith.constant dense<0.000000e+00> : vector<16x128xf32>
    %167 = tpu.matmul %165, %166, %cst_94 {dimension_numbers = #tpu.dot_dimension_numbers<[0], [0], [1], [1], [0, 1, 1, 1], [], []>} : vector<32x16xbf16>, vector<32x128xbf16>, vector<16x128xf32> -> vector<16x128xf32>
    %c0_95 = arith.constant 0 : index
    %c0_96 = arith.constant 0 : index
    %168 = vector.load %arg4[%c0_95, %c0_96] : memref<1x128xf32, #tpu.memory_space<vmem>>, vector<1x128xf32>
    %169 = vector.broadcast %168 : vector<1x128xf32> to vector<16x128xf32>
    %170 = arith.addf %167, %169 : vector<16x128xf32>
    %c0_97 = arith.constant 0 : index
    %c0_98 = arith.constant 0 : index
    %171 = vector.load %arg5[%c0_97, %c0_98] : memref<16x128xf32, #tpu.memory_space<vmem>>, vector<16x128xf32>
    tpu.vector_store %arg5[%c0_97, %c0_98], %170 {strides = array<i32>} : memref<16x128xf32, #tpu.memory_space<vmem>>, vector<16x128xf32>,
    return
  }
  func.func @transform_0(%arg0: i32) -> (i32, i32) {
    %c0_i32 = arith.constant 0 : i32
    %c0_i32_0 = arith.constant 0 : i32
    return %arg0, %c0_i32 : i32, i32
  }
  func.func @transform_1(%arg0: i32) -> (i32, i32) {
    %c0_i32 = arith.constant 0 : i32
    %c0_i32_0 = arith.constant 0 : i32
    %c0_i32_1 = arith.constant 0 : i32
    return %c0_i32, %c0_i32_0 : i32, i32
  }
  func.func @transform_2(%arg0: i32) -> (i32, i32) {
    %c0_i32 = arith.constant 0 : i32
    %c0_i32_0 = arith.constant 0 : i32
    %c0_i32_1 = arith.constant 0 : i32
    return %c0_i32, %c0_i32_0 : i32, i32
  }
  func.func @transform_3(%arg0: i32) -> (i32, i32) {
    %c0_i32 = arith.constant 0 : i32
    %c0_i32_0 = arith.constant 0 : i32
    %c0_i32_1 = arith.constant 0 : i32
    return %c0_i32, %c0_i32_0 : i32, i32
  }
  func.func @transform_4(%arg0: i32) -> (i32, i32) {
    %c0_i32 = arith.constant 0 : i32
    %c0_i32_0 = arith.constant 0 : i32
    return %arg0, %c0_i32 : i32, i32
  }
}

</mosaic_0001>

<bundles_post_ra>
// kernel: tpu_custom_call.1
= control target key start
LH: loop header
LB: loop body
LE: loop exit
PB: predicated region body
PF: predicated region fallthrough
CT: control target
= control target key end

     0   :  { %vm68_vm0 = vcmask 261120   ;;  %s1863_s0 = inlined_call_operand.vmem [shape: bf16[16,32], index: 0, kind: input, shape index: {}]   ;;  %s1864_s1 = inlined_call_operand.vmem [shape: bf16[96,32], index: 1, kind: input, shape index: {}]   ;;  %s1865_s2 = inlined_call_operand.vmem [shape: bf16[32,128], index: 2, kind: input, shape index: {}]   ;;  %s1866_s3 = inlined_call_operand.vmem [shape: f32[1,128], index: 3, kind: input, shape index: {}]   ;;  %s1867_s4 = inlined_call_operand.hbm [shape: f32[16,128], index: 4, kind: output, shape index: {}]  }
   0x1   :  { %v1567_v0 = vld [vmem:[%s1863_s0] sm:$0xff]   ;;  %v1569_v3 = vld [vmem:[%s1864_s1 + $0x8] sm:$0xff]   ;;  %v1570_v4 = vld [vmem:[%s1864_s1 + $0x10] sm:$0xff]  }
   0x2   :  { %v1568_v1 = vld [vmem:[%s1864_s1] sm:$0xff]   ;;  %1559 = vmatprep.subr.msk.bf16.mxu0 %vm68_vm0, %v1567_v0  ;;  %v88_v2 = vsel %vm68_vm0, %v1567_v0, 0 }
   0x3   :  { %1442 = vmatpush3.bf16.xpose.msra.mxu0 %v88_v2  ;;  %1443 = vmatprep.mubr.msk.bf16.mxu0 %vm68_vm0, %v1568_v1 }
   0x4   :  { %9 = vsyncpa [#allocation5], 0  ;;  %v1571_v5 = vld [vmem:[%s1864_s1 + $0x18] sm:$0xff]   ;;  %v1632_v6 = vmov 0.0   ;;  %vm1633_vm1 = vmmov 0   ;;  %vm171_vm2 = vcmask 130048  }
   0x5   :  { %1455 = vmatprep.subr.bf16.mxu1 %v1632_v6  ;;  %1479 = vmatprep.subr.bf16.mxu0 %v1632_v6  ;;  %s1634_s24 = smov 120   ;;  %vm210_vm3 = vcmask 1043456   ;;  %vm206_vm4 = vcmask 64512   ;;  %v1572_v24 = vld [vmem:[%s1864_s1 + $0x20] sm:$0xff]   ;;  %v1573_v25 = vld [vmem:[%s1864_s1 + $0x28] sm:$0xff]   ;;  %s1635_s1 = smov 8  }
   0x6   :  { %1457 = vmatprep.mubr.msk.bf16.mxu1 %vm1633_vm1, %v1632_v6  ;;  %vm834_vm5 = vcmask 130112   ;;  %s1636_s8 = smov [#allocation4]  }
   0x7   :  { %s1355_s9 = sshll.u32 %s1636_s8, 4  ;;  %s1356_s9 = int_to_ptr.vmem [resolvable:$true] %s1355_s9 }
   0x8   :  { %s1608_s10 = scalar_lea.vmem %s1356_s9, 256  ;;  %p1613_p1 = scmp.lt.s32.totalorder %s1356_s9, %s1356_s9 }
   0x9   :  { %p1609_p0 = scmp.ne.s32.totalorder %s1356_s9, %s1608_s10  ;;  %p1614_p2 = scmp.lt.s32.totalorder %s1608_s10, %s1608_s10 }
   0xa   :  { %1444 = vmatmul.mubr.msk.bf16.vlgmr.msra.gmra.mrb[0].mxu0 %vm68_vm0, %v1569_v3 }
   0xb   :  { %1447 = vmatprep.mubr.msk.bf16.mxu0 %vm68_vm0, %v1570_v4  ;;  %p1615_p3 = por %p1614_p2, %p1613_p1 }
   0xd   :  { %p1616_p4 = pnand %p1615_p3, %p1609_p0 }
  0x12   :  { %1448 = vmatmul.mubr.msk.bf16.gmra.mrb[4].mxu0 %vm68_vm0, %v1571_v5 }
  0x13   :  { %1451 = vmatprep.mubr.msk.bf16.mxu0 %vm68_vm0, %v1572_v24 }
  0x1a   :  { %1452 = vmatmul.mubr.msk.bf16.gmra.mrb[8].mxu0 %vm68_vm0, %v1573_v25 }
  0x1b   :  { %1481 = vmatprep.mubr.msk.bf16.mxu0 %vm1633_vm1, %v1632_v6 }
  0xdd   :  { %v1445_v7 = vpop.f32.mrb[0].mxu0 }
  0xde   :  { %174 = vst.msk [vmem:[#allocation2 + $0x10] sm:$0xff] %vm171_vm2, %v1445_v7  ;;  %v124_v8 = vpop.f32.mrb[1].mxu0 }
  0xdf   :  { %172 = vst.msk [vmem:[#allocation2] sm:$0xff] %vm171_vm2, %v124_v8  ;;  %v1446_v9 = vpop.f32.mrb[2].mxu0 }
  0xe0   :  { %175 = vst.msk [vmem:[#allocation2 + $0x18] sm:$0xff] %vm171_vm2, %v1446_v9  ;;  %v127_v10 = vpop.f32.mrb[3].mxu0 }
  0xe1   :  { %173 = vst.msk [vmem:[#allocation2 + $0x8] sm:$0xff] %vm171_vm2, %v127_v10 }
  0xe5   :  { %v1449_v11 = vpop.f32.mrb[4].mxu0  ;;  %v440_v33 = vld [vmem:[#allocation2 + $0x10] sm:$0xff] }
  0xe6   :  { %v694_v12 = vld [vmem:[#allocation2] sm:$0xff]  ;;  %178 = vst.msk [vmem:[#allocation2 + $0x30] sm:$0xff] %vm171_vm2, %v1449_v11  ;;  %v140_v13 = vpop.f32.mrb[5].mxu0  ;;  %v441_v34 = vpack.c.bf16 %v440_v33, %v440_v33 }
  0xe7   :  { %v695_v14 = vpack.c.bf16 %v694_v12, %v694_v12  ;;  %176 = vst.msk [vmem:[#allocation2 + $0x20] sm:$0xff] %vm171_vm2, %v140_v13  ;;  %v1450_v15 = vpop.f32.mrb[6].mxu0  ;;  %v567_v48 = vld [vmem:[#allocation2 + $0x18] sm:$0xff] }
  0xe8   :  { %179 = vst.msk [vmem:[#allocation2 + $0x38] sm:$0xff] %vm171_vm2, %v1450_v15  ;;  %v143_v16 = vpop.f32.mrb[7].mxu0  ;;  %v836_v31 = vld [vmem:[#allocation2 + $0x8] sm:$0xff]  ;;  %v568_v49 = vpack.c.bf16 %v567_v48, %v567_v48 }
  0xe9   :  { %701 = vrot.lane.b32.xlu1 %v695_v14, %s1634_s24  ;;  %190 = vxpose.xlu0.c.b16.start.end [1/1] (short) (narrow) %v695_v14, 16  ;;  %177 = vst.msk [vmem:[#allocation2 + $0x28] sm:$0xff] %vm171_vm2, %v143_v16  ;;  %v837_v32 = vpack.c.bf16 %v836_v31, %v836_v31 }
  0xed   :  { %v442_v17 = vld [vmem:[#allocation2 + $0x30] sm:$0xff]  ;;  %v1453_v46 = vpop.f32.mrb[8].mxu0 }
  0xee   :  { %v186_v18 = vld [vmem:[#allocation2 + $0x20] sm:$0xff]  ;;  %v443_v19 = vpack.c.bf16 %v442_v17, %v442_v17  ;;  %182 = vst.msk [vmem:[#allocation2 + $0x50] sm:$0xff] %vm171_vm2, %v1453_v46  ;;  %v156_v47 = vpop.f32.mrb[9].mxu0 }
  0xef   :  { %v187_v20 = vpack.c.bf16 %v186_v18, %v186_v18  ;;  %v569_v39 = vld [vmem:[#allocation2 + $0x38] sm:$0xff]  ;;  %180 = vst.msk [vmem:[#allocation2 + $0x40] sm:$0xff] %vm171_vm2, %v156_v47  ;;  %v1454_v52 = vpop.f32.mrb[10].mxu0 }
  0xf0   :  { %v466_v21 = vsel %vm210_vm3, %v443_v19, 0  ;;  %v570_v41 = vpack.c.bf16 %v569_v39, %v569_v39  ;;  %v838_v50 = vld [vmem:[#allocation2 + $0x28] sm:$0xff]  ;;  %183 = vst.msk [vmem:[#allocation2 + $0x58] sm:$0xff] %vm171_vm2, %v1454_v52  ;;  %v159_v53 = vpop.f32.mrb[11].mxu0 }
  0xf1   :  { %v212_v22 = vsel %vm210_vm3, %v187_v20, 0  ;;  %1480 = vmatpush3.bf16.msra.mxu0 %v466_v21  ;;  %v839_v51 = vpack.c.bf16 %v838_v50, %v838_v50  ;;  %181 = vst.msk [vmem:[#allocation2 + $0x48] sm:$0xff] %vm171_vm2, %v159_v53 }
  0xf2   :  { %1456 = vmatpush3.bf16.msra.mxu1 %v212_v22  ;;  %1491 = vmatprep.subr.bf16.mxu0 %v1632_v6  ;;  %v593_v43 = vsel %vm210_vm3, %v570_v41, 0 }
  0xf3   :  { %1461 = vmatprep.subr.bf16.mxu1 %v1632_v6  ;;  %v339_v4 = vsel %vm210_vm3, %v839_v51, 0 }
  0xf6   :  { %v188_v63 = vld [vmem:[#allocation2 + $0x40] sm:$0xff] }
  0xf7   :  { %v1738_v2 = vpack.c.bf16 %v188_v63, %v188_v63 }
 0x14f   :  { %v198_v23 = vpop.trf.xlu0 }
 0x150   :  { %1458 = vmatmul.mubr.msk.bf16.vlgmr.msra.gmra.mrb[0].mxu1 %vm206_vm4, %v198_v23 }
 0x151   :  { %1463 = vmatprep.mubr.msk.bf16.mxu1 %vm1633_vm1, %v1632_v6 }
 0x15b   :  { %v702_v35 = vpop.permute.xlu1 %701 }
 0x223   :  { %v248_v26 = vpop.f32.mrb[0].mxu1 }
 0x224   :  { %v1459_v27 = vpop.f32.mrb[1].mxu1  ;;  %v254_v28 = vsel %vm206_vm4, %v248_v26, -inf }
 0x225   :  { %255 = vmax.xlane.f32.xlu0 %v254_v28  ;;  %v251_v29 = vpop.f32.mrb[2].mxu1 }
 0x226   :  { %v1460_v30 = vpop.f32.mrb[3].mxu1 }
 0x23b   :  { %843 = vrot.lane.b32.xlu0 %v837_v32, %s1634_s24 }
 0x259   :  { %446 = vxpose.xlu0.c.b16.start.end [1/1] (short) (narrow) %v441_v34, 16 }
 0x262   :  { %721 = vrot.lane.b32.xlu0 %v187_v20, %s1634_s24 }
 0x266   :  { %1004 = vrot.lane.b32.xlu0 %v443_v19, %s1634_s24 }
 0x284   :  { %704 = vxpose.xlu0.c.b16.start.end [1/1] (short) (narrow) %v702_v35, 16 }
 0x2b2   :  { %v256_v36 = vpop.xlane.xlu0 %255 }
 0x2b3   :  { %v257_v37 = vsub.f32 %v248_v26, %v256_v36 }
 0x2b5   :  { %v258_v38 = vmul.f32 1.442695, %v257_v37 }
 0x2b6   :  { %v844_v40 = vpop.permute.xlu0 %843 }
 0x2b7   :  { %1576 = vpow2.f32 %v258_v38 }
 0x2bf   :  { %v454_v42 = vpop.trf.xlu0 }
 0x2c0   :  { %1482 = vmatmul.mubr.msk.bf16.vlgmr.msra.gmra.mrb[12].mxu0 %vm206_vm4, %v454_v42 }
 0x2c1   :  { %v1577_v44 = vpop.eup %1576  ;;  %1492 = vmatpush3.bf16.msra.mxu0 %v593_v43  ;;  %1493 = vmatprep.mubr.msk.bf16.mxu0 %vm1633_vm1, %v1632_v6 }
 0x2c2   :  { %v260_v45 = vsel %vm206_vm4, %v1577_v44, 0.0  ;;  %1503 = vmatprep.subr.bf16.mxu0 %v1632_v6 }
 0x2c3   :  { %261 = vadd.xlane.f32.xlu1 %v260_v45 }
 0x2d4   :  { %984 = vrot.lane.b32.xlu1 %v441_v34, %s1634_s24  ;;  %v722_v58 = vpop.permute.xlu0 %721 }
 0x2d5   :  { %v727_v0 = vsel %vm210_vm3, %v722_v58, 0 }
 0x2d8   :  { %v1005_v1 = vpop.permute.xlu0 %1004 }
 0x2d9   :  { %v1010_v11 = vsel %vm210_vm3, %v1005_v1, 0 }
 0x2ea   :  { %v712_v3 = vpop.trf.xlu0 }
 0x2f7   :  { %319 = vxpose.xlu1.c.b16.start.end [1/1] (short) (narrow) %v837_v32, 16 }
 0x2fb   :  { %573 = vxpose.xlu1.c.b16.start.end [1/1] (short) (narrow) %v568_v49, 16 }
 0x2ff   :  { %1125 = vrot.lane.b32.xlu1 %v568_v49, %s1634_s24 }
 0x303   :  { %863 = vrot.lane.b32.xlu1 %v839_v51, %s1634_s24 }
 0x307   :  { %1145 = vrot.lane.b32.xlu1 %v570_v41, %s1634_s24 }
 0x32a   :  { %846 = vxpose.xlu1.c.b16.start.end [1/1] (short) (narrow) %v844_v40, 16 }
 0x350   :  { %v262_v54 = vpop.xlane.xlu1 %261 }
 0x351   :  { %1578 = vrcp.f32 %v262_v54 }
 0x354   :  { %v985_v55 = vpop.permute.xlu1 %984 }
 0x355   :  { %987 = vxpose.xlu0.c.b16.start.end [1/1] (short) (narrow) %v985_v55, 16 }
 0x35b   :  { %v1579_v56 = vpop.eup %1578 }
 0x35c   :  { %v264_v57 = vmul.f32 %v1579_v56, %v1577_v44 }
 0x35d   :  { %v327_v59 = vpop.trf.xlu1 }
 0x35e   :  { %v265_v60 = vpack.c.bf16 %v264_v57, %v264_v57 }
 0x360   :  { %v270_v61 = vsel %vm206_vm4, %v265_v60, 0 }
 0x361   :  { %1462 = vmatpush3.bf16.xpose.msra.mxu1 %v270_v61  ;;  %v581_v62 = vpop.trf.xlu1 }
 0x362   :  { %1494 = vmatmul.mubr.msk.bf16.vlgmr.msra.gmra.mrb[16].mxu0 %vm206_vm4, %v581_v62  ;;  %1467 = vmatprep.subr.bf16.mxu1 %v1632_v6 }
 0x363   :  { %1504 = vmatpush3.bf16.msra.mxu0 %v727_v0  ;;  %1505 = vmatprep.mubr.msk.bf16.mxu0 %vm1633_vm1, %v1632_v6 }
 0x364   :  { %1515 = vmatprep.subr.bf16.mxu0 %v1632_v6 }
 0x368   :  { %1464 = vmatmul.mubr.msk.bf16.vlgmr.msra.gmra.mrb[4].mxu1 %vm206_vm4, %v1738_v2 }
 0x369   :  { %1468 = vmatpush3.bf16.msra.mxu1 %v339_v4  ;;  %1469 = vmatprep.mubr.msk.bf16.mxu1 %vm1633_vm1, %v1632_v6 }
 0x36a   :  { %1506 = vmatmul.mubr.msk.bf16.vlgmr.msra.gmra.mrb[20].mxu0 %vm206_vm4, %v712_v3  ;;  %1473 = vmatprep.subr.bf16.mxu1 %v1632_v6 }
 0x36b   :  { %1517 = vmatprep.mubr.msk.bf16.mxu0 %vm1633_vm1, %v1632_v6 }
 0x370   :  { %1470 = vmatmul.mubr.msk.bf16.vlgmr.msra.gmra.mrb[8].mxu1 %vm206_vm4, %v327_v59 }
 0x371   :  { %v1126_v5 = vpop.permute.xlu1 %1125  ;;  %1475 = vmatprep.mubr.msk.bf16.mxu1 %vm1633_vm1, %v1632_v6 }
 0x372   :  { %1128 = vxpose.xlu0.c.b16.start.end [1/1] (short) (narrow) %v1126_v5, 16 }
 0x375   :  { %v864_v7 = vpop.permute.xlu1 %863 }
 0x376   :  { %v869_v8 = vsel %vm210_vm3, %v864_v7, 0 }
 0x377   :  { %1516 = vmatpush3.bf16.msra.mxu0 %v869_v8 }
 0x378   :  { %1527 = vmatprep.subr.bf16.mxu0 %v1632_v6 }
 0x379   :  { %v1146_v9 = vpop.permute.xlu1 %1145 }
 0x37a   :  { %v1151_v17 = vsel %vm210_vm3, %v1146_v9, 0 }
 0x390   :  { %v854_v10 = vpop.trf.xlu1 }
 0x391   :  { %1518 = vmatmul.mubr.msk.bf16.vlgmr.msra.gmra.mrb[24].mxu0 %vm206_vm4, %v854_v10 }
 0x392   :  { %1528 = vmatpush3.bf16.msra.mxu0 %v1010_v11  ;;  %1529 = vmatprep.mubr.msk.bf16.mxu0 %vm1633_vm1, %v1632_v6 }
 0x393   :  { %1539 = vmatprep.subr.bf16.mxu0 %v1632_v6  ;;  %v502_v12 = vpop.f32.mrb[12].mxu0 }
 0x394   :  { %v1483_v13 = vpop.f32.mrb[13].mxu0  ;;  %v508_v36 = vsel %vm206_vm4, %v502_v12, -inf }
 0x395   :  { %v505_v14 = vpop.f32.mrb[14].mxu0 }
 0x396   :  { %v1484_v15 = vpop.f32.mrb[15].mxu0 }
 0x3bb   :  { %v995_v16 = vpop.trf.xlu0 }
 0x3bc   :  { %1530 = vmatmul.mubr.msk.bf16.vlgmr.msra.gmra.mrb[28].mxu0 %vm206_vm4, %v995_v16 }
 0x3bd   :  { %1540 = vmatpush3.bf16.msra.mxu0 %v1151_v17  ;;  %1541 = vmatprep.mubr.msk.bf16.mxu0 %vm1633_vm1, %v1632_v6 }
 0x3be   :  { %1551 = vmatprep.subr.bf16.mxu0 %v1632_v6 }
 0x3d8   :  { %v1136_v18 = vpop.trf.xlu0 }
 0x3d9   :  { %1542 = vmatmul.mubr.msk.bf16.vlgmr.msra.gmra.mrb[32].mxu0 %vm206_vm4, %v1136_v18 }
 0x3da   :  { %1555 = vmatprep.mubr.msk.bf16.mxu0 %vm1633_vm1, %v1632_v6 }
 0x435   :  { %v629_v19 = vpop.f32.mrb[16].mxu0 }
 0x436   :  { %v1495_v20 = vpop.f32.mrb[17].mxu0  ;;  %v635_v37 = vsel %vm206_vm4, %v629_v19, -inf }
 0x437   :  { %v632_v21 = vpop.f32.mrb[18].mxu0 }
 0x438   :  { %v1496_v22 = vpop.f32.mrb[19].mxu0 }
 0x43b   :  { %v306_v23 = vpop.f32.mrb[4].mxu1 }
 0x43c   :  { %312 = vst.msk [vmem:[#allocation3] sm:$0xff] %vm206_vm4, %v306_v23  ;;  %v1465_v24 = vpop.f32.mrb[5].mxu1 }
 0x43d   :  { %v309_v25 = vpop.f32.mrb[6].mxu1  ;;  %v763_v26 = vpop.f32.mrb[20].mxu0 }
 0x43e   :  { %v1466_v27 = vpop.f32.mrb[7].mxu1  ;;  %v1507_v28 = vpop.f32.mrb[21].mxu0  ;;  %v769_v38 = vsel %vm206_vm4, %v763_v26, -inf  ;;  %v981_v25 = vld [vmem:[#allocation2 + $0x50] sm:$0xff] }
 0x43f   :  { %v766_v29 = vpop.f32.mrb[22].mxu0  ;;  %v1122_v27 = vld [vmem:[#allocation2 + $0x58] sm:$0xff] }
 0x440   :  { %v1508_v30 = vpop.f32.mrb[23].mxu0  ;;  %v1123_v28 = vpack.c.bf16 %v1122_v27, %v1122_v27 }
 0x443   :  { %v375_v31 = vpop.f32.mrb[8].mxu1 }
 0x444   :  { %v1471_v32 = vpop.f32.mrb[9].mxu1  ;;  %v381_v33 = vsel %vm206_vm4, %v375_v31, -inf }
 0x445   :  { %382 = vmax.xlane.f32.xlu0 %v381_v33  ;;  %v378_v34 = vpop.f32.mrb[10].mxu1 }
 0x446   :  { %v1472_v35 = vpop.f32.mrb[11].mxu1 }
 0x449   :  { %509 = vmax.xlane.f32.xlu0 %v508_v36 }
 0x44d   :  { %636 = vmax.xlane.f32.xlu0 %v635_v37 }
 0x451   :  { %770 = vmax.xlane.f32.xlu0 %v769_v38 }
 0x464   :  { %v905_v39 = vpop.f32.mrb[24].mxu0 }
 0x465   :  { %v911_v40 = vsel %vm206_vm4, %v905_v39, -inf  ;;  %v1519_v41 = vpop.f32.mrb[25].mxu0 }
 0x466   :  { %912 = vmax.xlane.f32.xlu1 %v911_v40  ;;  %v908_v42 = vpop.f32.mrb[26].mxu0 }
 0x467   :  { %v1520_v43 = vpop.f32.mrb[27].mxu0 }
 0x48f   :  { %v1046_v44 = vpop.f32.mrb[28].mxu0 }
 0x490   :  { %v1052_v45 = vsel %vm206_vm4, %v1046_v44, -inf  ;;  %v1531_v46 = vpop.f32.mrb[29].mxu0 }
 0x491   :  { %1053 = vmax.xlane.f32.xlu0 %v1052_v45  ;;  %v1049_v47 = vpop.f32.mrb[30].mxu0 }
 0x492   :  { %v1532_v48 = vpop.f32.mrb[31].mxu0 }
 0x4ac   :  { %v1187_v49 = vpop.f32.mrb[32].mxu0 }
 0x4ad   :  { %v1543_v50 = vpop.f32.mrb[33].mxu0  ;;  %v1193_v51 = vsel %vm206_vm4, %v1187_v49, -inf }
 0x4ae   :  { %1194 = vmax.xlane.f32.xlu0 %v1193_v51  ;;  %v1190_v52 = vpop.f32.mrb[34].mxu0 }
 0x4af   :  { %v1544_v53 = vpop.f32.mrb[35].mxu0 }
 0x4d2   :  { %v383_v54 = vpop.xlane.xlu0 %382 }
 0x4d3   :  { %v384_v55 = vsub.f32 %v375_v31, %v383_v54  ;;  %v840_v31 = vld [vmem:[#allocation2 + $0x48] sm:$0xff] }
 0x4d4   :  { %v841_v32 = vpack.c.bf16 %v840_v31, %v840_v31 }
 0x4d5   :  { %v385_v56 = vmul.f32 1.442695, %v384_v55 }
 0x4d6   :  { %v510_v57 = vpop.xlane.xlu0 %509 }
 0x4d7   :  { %1580 = vpow2.f32 %v385_v56  ;;  %v511_v58 = vsub.f32 %v502_v12, %v510_v57 }
 0x4d9   :  { %v512_v59 = vmul.f32 1.442695, %v511_v58 }
 0x4da   :  { %v637_v60 = vpop.xlane.xlu0 %636 }
 0x4db   :  { %1582 = vpow2.f32 %v512_v59  ;;  %v638_v61 = vsub.f32 %v629_v19, %v637_v60 }
 0x4dd   :  { %v639_v62 = vmul.f32 1.442695, %v638_v61 }
 0x4de   :  { %v771_v63 = vpop.xlane.xlu0 %770 }
 0x4df   :  { %1584 = vpow2.f32 %v639_v62  ;;  %v772_v0 = vsub.f32 %v763_v26, %v771_v63  ;;  %v982_v26 = vpack.c.bf16 %v981_v25, %v981_v25 }
 0x4e1   :  { %v1581_v1 = vpop.eup %1580  ;;  %v773_v3 = vmul.f32 1.442695, %v772_v0 }
 0x4e2   :  { %v387_v4 = vsel %vm206_vm4, %v1581_v1, 0.0 }
 0x4e3   :  { %1586 = vpow2.f32 %v773_v3  ;;  %388 = vadd.xlane.f32.xlu0 %v387_v4 }
 0x4e5   :  { %v1583_v5 = vpop.eup %1582 }
 0x4e6   :  { %v514_v7 = vsel %vm206_vm4, %v1583_v5, 0.0 }
 0x4e7   :  { %515 = vadd.xlane.f32.xlu1 %v514_v7 }
 0x4e9   :  { %v1585_v8 = vpop.eup %1584 }
 0x4ea   :  { %v641_v9 = vsel %vm206_vm4, %v1585_v8, 0.0 }
 0x4eb   :  { %642 = vadd.xlane.f32.xlu0 %v641_v9 }
 0x4ed   :  { %v1587_v10 = vpop.eup %1586 }
 0x4ee   :  { %v775_v11 = vsel %vm206_vm4, %v1587_v10, 0.0 }
 0x4ef   :  { %776 = vadd.xlane.f32.xlu1 %v775_v11 }
 0x4f3   :  { %v913_v12 = vpop.xlane.xlu1 %912 }
 0x4f4   :  { %v914_v13 = vsub.f32 %v905_v39, %v913_v12 }
 0x4f6   :  { %v915_v14 = vmul.f32 1.442695, %v914_v13 }
 0x4f8   :  { %1588 = vpow2.f32 %v915_v14 }
 0x502   :  { %v1780_v15 = vpop.eup %1588 }
 0x503   :  { %v917_v16 = vsel %vm206_vm4, %v1780_v15, 0.0 }
 0x504   :  { %918 = vadd.xlane.f32.xlu0 %v917_v16 }
 0x51e   :  { %v1054_v17 = vpop.xlane.xlu0 %1053 }
 0x51f   :  { %v1055_v18 = vsub.f32 %v1046_v44, %v1054_v17 }
 0x521   :  { %v1056_v19 = vmul.f32 1.442695, %v1055_v18 }
 0x523   :  { %1590 = vpow2.f32 %v1056_v19 }
 0x52d   :  { %v1784_v20 = vpop.eup %1590 }
 0x52e   :  { %v1058_v21 = vsel %vm206_vm4, %v1784_v20, 0.0 }
 0x52f   :  { %1059 = vadd.xlane.f32.xlu1 %v1058_v21 }
 0x53b   :  { %v1195_v22 = vpop.xlane.xlu0 %1194 }
 0x53c   :  { %v1196_v23 = vsub.f32 %v1187_v49, %v1195_v22 }
 0x53e   :  { %v1197_v24 = vmul.f32 1.442695, %v1196_v23 }
 0x540   :  { %1592 = vpow2.f32 %v1197_v24  ;;  %782 = vrot.lane.b32.xlu1 %v1738_v2, %s1634_s24 }
 0x544   :  { %1065 = vrot.lane.b32.xlu1 %v982_v26, %s1634_s24 }
 0x548   :  { %1206 = vrot.lane.b32.xlu1 %v1123_v28, %s1634_s24 }
 0x54a   :  { %v1792_v29 = vpop.eup %1592 }
 0x54b   :  { %v1199_v30 = vsel %vm206_vm4, %v1792_v29, 0.0 }
 0x54c   :  { %1200 = vadd.xlane.f32.xlu0 %v1199_v30 }
 0x562   :  { %924 = vrot.lane.b32.xlu0 %v841_v32, %s1634_s24 }
 0x570   :  { %v389_v33 = vpop.xlane.xlu0 %388 }
 0x571   :  { %1594 = vrcp.f32 %v389_v33  ;;  %v1574_v33 = vld [vmem:[%s1865_s2] sm:$0xff]  }
 0x572   :  { %1552 = vmatpush3.bf16.msra.mxu0 %v1574_v33 }
 0x573   :  { %1553 = vmatprep.subr.bf16.mxu0 %v1632_v6 }
 0x574   :  { %v516_v2 = vpop.xlane.xlu1 %515 }
 0x575   :  { %1596 = vrcp.f32 %v516_v2 }
 0x578   :  { %v643_v34 = vpop.xlane.xlu0 %642 }
 0x579   :  { %1598 = vrcp.f32 %v643_v34  ;;  %v1575_v34 = vld [vmem:[%s1865_s2 + $0x8] sm:$0xff]  }
 0x57a   :  { %1554 = vmatpush3.bf16.msra.mxu0 %v1575_v34 }
 0x57b   :  { %v1595_v35 = vpop.eup %1594 }
 0x57c   :  { %v391_v36 = vmul.f32 %v1595_v35, %v1581_v1  ;;  %v777_v39 = vpop.xlane.xlu1 %776 }
 0x57d   :  { %1600 = vrcp.f32 %v777_v39 }
 0x57e   :  { %v392_v37 = vpack.c.bf16 %v391_v36, %v391_v36 }
 0x57f   :  { %v1597_v38 = vpop.eup %1596 }
 0x580   :  { %v397_v40 = vsel %vm206_vm4, %v392_v37, 0  ;;  %v518_v41 = vmul.f32 %v1597_v38, %v1583_v5 }
 0x581   :  { %1474 = vmatpush3.bf16.xpose.msra.mxu1 %v397_v40 }
 0x582   :  { %1485 = vmatprep.subr.bf16.mxu1 %v1632_v6  ;;  %v519_v42 = vpack.c.bf16 %v518_v41, %v518_v41 }
 0x583   :  { %v1599_v43 = vpop.eup %1598 }
 0x584   :  { %v524_v44 = vsel %vm206_vm4, %v519_v42, 0  ;;  %v645_v45 = vmul.f32 %v1599_v43, %v1585_v8 }
 0x586   :  { %v646_v46 = vpack.c.bf16 %v645_v45, %v645_v45 }
 0x587   :  { %v1601_v47 = vpop.eup %1600 }
 0x588   :  { %1476 = vmatmul.mubr.msk.bf16.vlgmr.msra.gmra.mrb[12].mxu1 %vm206_vm4, %v841_v32  ;;  %v651_v48 = vsel %vm206_vm4, %v646_v46, 0  ;;  %v779_v49 = vmul.f32 %v1601_v47, %v1587_v10 }
 0x589   :  { %1486 = vmatpush3.bf16.xpose.msra.mxu1 %v524_v44  ;;  %1487 = vmatprep.mubr.msk.bf16.mxu1 %vm1633_vm1, %v1632_v6 }
 0x58a   :  { %1497 = vmatprep.subr.bf16.mxu1 %v1632_v6  ;;  %v780_v50 = vpack.c.bf16 %v779_v49, %v779_v49 }
 0x58c   :  { %v788_v51 = vsel %vm206_vm4, %v780_v50, 0 }
 0x590   :  { %1488 = vmatmul.mubr.msk.bf16.vlgmr.msra.gmra.mrb[16].mxu1 %vm206_vm4, %v982_v26 }
 0x591   :  { %1498 = vmatpush3.bf16.xpose.msra.mxu1 %v651_v48  ;;  %1499 = vmatprep.mubr.msk.bf16.mxu1 %vm1633_vm1, %v1632_v6  ;;  %v919_v52 = vpop.xlane.xlu0 %918  ;;  %v1395_v48 = vld [vmem:[%s1866_s3] ss:$0 sm:$0xff] }
 0x592   :  { %1509 = vmatprep.subr.bf16.mxu1 %v1632_v6  ;;  %1602 = vrcp.f32 %v919_v52 }
 0x598   :  { %1500 = vmatmul.mubr.msk.bf16.vlgmr.msra.gmra.mrb[20].mxu1 %vm206_vm4, %v1123_v28 }
 0x599   :  { %1510 = vmatpush3.bf16.xpose.msra.mxu1 %v788_v51  ;;  %1511 = vmatprep.mubr.msk.bf16.mxu1 %vm1633_vm1, %v1632_v6 }
 0x59a   :  { %1521 = vmatprep.subr.bf16.mxu1 %v1632_v6 }
 0x59c   :  { %v1603_v53 = vpop.eup %1602 }
 0x59d   :  { %v921_v54 = vmul.f32 %v1603_v53, %v1780_v15 }
 0x59f   :  { %v922_v56 = vpack.c.bf16 %v921_v54, %v921_v54 }
 0x5a1   :  { %v930_v58 = vsel %vm206_vm4, %v922_v56, 0 }
 0x5bc   :  { %v1060_v55 = vpop.xlane.xlu1 %1059 }
 0x5bd   :  { %1604 = vrcp.f32 %v1060_v55 }
 0x5c0   :  { %v783_v57 = vpop.permute.xlu1 %782 }
 0x5c1   :  { %1512 = vmatmul.mubr.msk.bf16.vlgmr.msra.gmra.mrb[24].mxu1 %vm206_vm4, %v783_v57 }
 0x5c2   :  { %1522 = vmatpush3.bf16.xpose.msra.mxu1 %v930_v58  ;;  %1523 = vmatprep.mubr.msk.bf16.mxu1 %vm1633_vm1, %v1632_v6 }
 0x5c3   :  { %1533 = vmatprep.subr.bf16.mxu1 %v1632_v6 }
 0x5c4   :  { %v1066_v3 = vpop.permute.xlu1 %1065 }
 0x5c7   :  { %v1605_v59 = vpop.eup %1604 }
 0x5c8   :  { %v1062_v60 = vmul.f32 %v1605_v59, %v1784_v20  ;;  %v1207_v8 = vpop.permute.xlu1 %1206 }
 0x5ca   :  { %v1063_v62 = vpack.c.bf16 %v1062_v60, %v1062_v60 }
 0x5cc   :  { %v1071_v0 = vsel %vm206_vm4, %v1063_v62, 0 }
 0x5d9   :  { %v1201_v61 = vpop.xlane.xlu0 %1200 }
 0x5da   :  { %1606 = vrcp.f32 %v1201_v61 }
 0x5dd   :  { %v925_v63 = vpop.permute.xlu0 %924 }
 0x5de   :  { %1524 = vmatmul.mubr.msk.bf16.vlgmr.msra.gmra.mrb[28].mxu1 %vm206_vm4, %v925_v63 }
 0x5df   :  { %1534 = vmatpush3.bf16.xpose.msra.mxu1 %v1071_v0  ;;  %1535 = vmatprep.mubr.msk.bf16.mxu1 %vm1633_vm1, %v1632_v6 }
 0x5e0   :  { %1545 = vmatprep.subr.bf16.mxu1 %v1632_v6 }
 0x5e4   :  { %v1607_v1 = vpop.eup %1606 }
 0x5e5   :  { %v1203_v4 = vmul.f32 %v1607_v1, %v1792_v29 }
 0x5e6   :  { %1536 = vmatmul.mubr.msk.bf16.vlgmr.msra.gmra.mrb[32].mxu1 %vm206_vm4, %v1066_v3 }
 0x5e7   :  { %v1204_v5 = vpack.c.bf16 %v1203_v4, %v1203_v4  ;;  %1547 = vmatprep.mubr.msk.bf16.mxu1 %vm1633_vm1, %v1632_v6 }
 0x5e9   :  { %v1212_v7 = vsel %vm206_vm4, %v1204_v5, 0 }
 0x5ea   :  { %1546 = vmatpush3.bf16.xpose.msra.mxu1 %v1212_v7 }
 0x5f1   :  { %1548 = vmatmul.mubr.msk.bf16.vlgmr.msra.gmra.mrb[36].mxu1 %vm206_vm4, %v1207_v8 }
 0x65b   :  { %v433_v9 = vpop.f32.mrb[12].mxu1 }
 0x65c   :  { %439 = vst.msk [vmem:[#allocation3 + $0x8] sm:$0xff] %vm206_vm4, %v433_v9  ;;  %v1477_v10 = vpop.f32.mrb[13].mxu1 }
 0x65d   :  { %v436_v11 = vpop.f32.mrb[14].mxu1 }
 0x65e   :  { %v1478_v12 = vpop.f32.mrb[15].mxu1 }
 0x663   :  { %v560_v13 = vpop.f32.mrb[16].mxu1 }
 0x664   :  { %566 = vst.msk [vmem:[#allocation3 + $0x10] sm:$0xff] %vm206_vm4, %v560_v13  ;;  %v1489_v14 = vpop.f32.mrb[17].mxu1 }
 0x665   :  { %v563_v15 = vpop.f32.mrb[18].mxu1 }
 0x666   :  { %v1490_v16 = vpop.f32.mrb[19].mxu1 }
 0x66b   :  { %v687_v17 = vpop.f32.mrb[20].mxu1 }
 0x66c   :  { %693 = vst.msk [vmem:[#allocation3 + $0x18] sm:$0xff] %vm206_vm4, %v687_v17  ;;  %v1501_v18 = vpop.f32.mrb[21].mxu1 }
 0x66d   :  { %v690_v19 = vpop.f32.mrb[22].mxu1 }
 0x66e   :  { %v1502_v20 = vpop.f32.mrb[23].mxu1 }
 0x694   :  { %v824_v21 = vpop.f32.mrb[24].mxu1 }
 0x695   :  { %831 = vrot.lane.b32.xlu0 %v824_v21, %s1635_s1  ;;  %v1513_v22 = vpop.f32.mrb[25].mxu1 }
 0x696   :  { %v827_v23 = vpop.f32.mrb[26].mxu1 }
 0x697   :  { %v1514_v24 = vpop.f32.mrb[27].mxu1 }
 0x6b1   :  { %v966_v25 = vpop.f32.mrb[28].mxu1 }
 0x6b2   :  { %973 = vrot.lane.b32.xlu1 %v966_v25, %s1635_s1  ;;  %v1525_v26 = vpop.f32.mrb[29].mxu1 }
 0x6b3   :  { %v969_v27 = vpop.f32.mrb[30].mxu1 }
 0x6b4   :  { %v1526_v28 = vpop.f32.mrb[31].mxu1 }
 0x6b9   :  { %v1107_v29 = vpop.f32.mrb[32].mxu1 }
 0x6ba   :  { %1114 = vrot.lane.b32.xlu0 %v1107_v29, %s1635_s1  ;;  %v1537_v30 = vpop.f32.mrb[33].mxu1 }
 0x6bb   :  { %v1110_v31 = vpop.f32.mrb[34].mxu1 }
 0x6bc   :  { %v1538_v32 = vpop.f32.mrb[35].mxu1 }
 0x6c4   :  { %v1248_v2 = vpop.f32.mrb[36].mxu1 }
 0x6c5   :  { %1255 = vrot.lane.b32.xlu1 %v1248_v2, %s1635_s1  ;;  %v1549_v35 = vpop.f32.mrb[37].mxu1 }
 0x6c6   :  { %v1251_v36 = vpop.f32.mrb[38].mxu1 }
 0x6c7   :  { %v1550_v37 = vpop.f32.mrb[39].mxu1 }
 0x707   :  { %v832_v38 = vpop.permute.xlu0 %831 }
 0x708   :  { %835 = vst.msk [vmem:[#allocation3] sm:$0xff] %vm834_vm5, %v832_v38 }
 0x70f   :  { %v1259_v41 = vld [vmem:[#allocation3] sm:$0xff] }
 0x724   :  { %v974_v39 = vpop.permute.xlu1 %973 }
 0x725   :  { %976 = vst.msk [vmem:[#allocation3 + $0x8] sm:$0xff] %vm834_vm5, %v974_v39 }
 0x72c   :  { %v1115_v40 = vpop.permute.xlu0 %1114  ;;  %v1260_v42 = vld [vmem:[#allocation3 + $0x8] sm:$0xff] }
 0x72d   :  { %1117 = vst.msk [vmem:[#allocation3 + $0x10] sm:$0xff] %vm834_vm5, %v1115_v40  ;;  %v1263_v43 = vpack.c.bf16 %v1260_v42, %v1259_v41 }
 0x72f   :  { %1276 = vxpose.xlu0.c.b16.start [1/2] (short) (narrow) %v1263_v43, 16 }
 0x734   :  { %v1261_v45 = vld [vmem:[#allocation3 + $0x10] sm:$0xff] }
 0x737   :  { %v1256_v44 = vpop.permute.xlu1 %1255 }
 0x738   :  { %1258 = vst.msk [vmem:[#allocation3 + $0x18] sm:$0xff] %vm834_vm5, %v1256_v44 }
 0x73f   :  { %v1262_v46 = vld [vmem:[#allocation3 + $0x18] sm:$0xff] }
 0x740   :  { %v1264_v47 = vpack.c.bf16 %v1262_v46, %v1261_v45 }
 0x742   :  { %1277 = vxpose.xlu0.c.b16.end [2/2] (short) (narrow) %v1264_v47, 16 }
 0x7a4   :  { %v1284_v6 = vpop.trf.xlu0 }
 0x7a5   :  { %1556 = vmatmul.mubr.msk.bf16.vlgmr.msra.gmra.mrb[36].mxu0 %vm68_vm0, %v1284_v6 }
 0x878   :  { %v1341_v49 = vpop.f32.mrb[36].mxu0 }
 0x879   :  { %v1342_v50 = vadd.f32 %v1395_v48, %v1341_v49  ;;  %v1557_v51 = vpop.f32.mrb[37].mxu0 }
 0x87a   :  { %v1344_v52 = vpop.f32.mrb[38].mxu0 }
 0x87b   :  { %1348 = vst [vmem:[#allocation4] sm:$0xff] %v1342_v50  ;;  %v1345_v53 = vadd.f32 %v1395_v48, %v1344_v52  ;;  %v1558_v54 = vpop.f32.mrb[39].mxu0 }
 0x87d   :  { %1349 = vst [vmem:[#allocation4 + $0x8] sm:$0xff] %v1345_v53 }
 0x87e   :  { %1619 = shalt.err (!%p1616_p4)
}
 0x87f   :  { %s1620_s12 = scalar_lea.hbm %s1867_s4, 256 }
 0x880   :  { %p1621_p5 = scmp.ne.s32.totalorder %s1867_s4, %s1620_s12  ;;  %p1624_p6 = scmp.lt.u32.totalorder %s1620_s12, %s1867_s4 }
 0x882   :  { %p1626_p7 = pnand %p1624_p6, %p1621_p5 }
 0x884   :  { %1629 = shalt.err (!%p1626_p7)
}
 0x885   :  { %s1637_s17 = smov 128  }
 0x886   :  { %1361 = dma.vmem_to_hbm [thread:$0]  %s1356_s9, 256, %s1867_s4, [#allocation5], %s1637_s17, %s1637_s17, %s1635_s1  }
 0x887   :  { %1630 = dma.done.wait [#allocation5], 256  }
 0x888   :  { %1631 = vsyncadd [#allocation5], 4294967040 }
 0x889   :  { %1365 = vsyncpa [#allocation5], 1 }

</bundles_post_ra>
